<compile_context>
chip_gen: v7x
topology: tpu7x:2x2x1
jax: 0.10.0
libtpu: 0.0.40
codegen_flags: <defaults>
</compile_context>

<pallas_src>
from enum import Enum

import jax
import jax.numpy as jnp
from jax.experimental import pallas as pl
from jax.experimental.pallas import tpu as pltpu


class ChangeState(Enum):
    NORMALIZE = 0
    DENORMALIZE = 1
    OFF = 2


SIGMA_MIN = 1e-5
IMAGENET_MEAN = jnp.array([123.675, 116.28, 103.53], dtype=jnp.float32)
IMAGENET_VAR = jnp.array([3409.976025, 3262.6944, 3291.890625], dtype=jnp.float32)

# Universal tile (multiple of (8, 128)); 2 MiB per f32 buffer.
_TR_MAX = 256
_TC_MAX = 2048


def _round_up(x: int, m: int) -> int:
    return ((x + m - 1) // m) * m


def _pick_tiles(R: int, HW: int):
    tr = min(_TR_MAX, _round_up(R, 8))
    tc = min(_TC_MAX, _round_up(HW, 128))
    return tr, tc


# ---------------- Pallas kernels (elementwise hot path) ----------------

def _scale_bias_kernel(x_ref, scale_ref, bias_ref, o_ref):
    # x_ref: (TR, TC); scale_ref/bias_ref: (TR, 1) -> broadcast across lanes.
    o_ref[...] = x_ref[...] * scale_ref[...] + bias_ref[...]


def _sigmoid_kernel(x_ref, o_ref):
    o_ref[...] = jax.nn.sigmoid(x_ref[...])


# ---------------- wrapper ----------------

def change_image_stats_to_imagenet(x, direction: ChangeState, input_channels: int = 3):
    """x: (N, C, H, W), C == input_channels, C % 3 == 0."""
    if input_channels % 3 != 0:
        raise ValueError(f"input_channels {input_channels}, should divide be 3 ")
    if direction == ChangeState.OFF:
        return x

    N, C, H, W = x.shape
    assert C == input_channels
    R, HW = N * C, H * W
    x2 = x.reshape(R, HW)

    TR, TC = _pick_tiles(R, HW)
    grid = (pl.cdiv(R, TR), pl.cdiv(HW, TC))
    x_spec = pl.BlockSpec((TR, TC), lambda i, j: (i, j))
    o_spec = pl.BlockSpec((TR, TC), lambda i, j: (i, j))
    col_spec = pl.BlockSpec((TR, 1), lambda i, j: (i, 0))
    cparams = pltpu.CompilerParams(
        dimension_semantics=("parallel", "parallel"))

    if direction == ChangeState.DENORMALIZE:
        out2 = pl.pallas_call(
            _sigmoid_kernel,
            out_shape=jax.ShapeDtypeStruct((R, HW), x.dtype),
            grid=grid,
            in_specs=[x_spec],
            out_specs=o_spec,
            compiler_params=cparams,
        )(x2)
        return out2.reshape(N, C, H, W)

    # NORMALIZE: fold per-channel ImageNet stats into scale/bias rows:
    #   (x - mean) / sqrt(var + eps)  ==  x * scale + bias
    #   scale = 1/sqrt(var + eps),  bias = -mean * scale
    repeat = input_channels // 3
    mean_c = jnp.tile(IMAGENET_MEAN, repeat)                       # (C,)
    var_c = jnp.tile(IMAGENET_VAR, repeat)                         # (C,)
    scale_c = 1.0 / jnp.sqrt(var_c + SIGMA_MIN)                    # (C,)
    bias_c = -mean_c * scale_c                                     # (C,)
    scale_rows = jnp.tile(scale_c, N).reshape(R, 1).astype(x.dtype)  # (R, 1)
    bias_rows = jnp.tile(bias_c, N).reshape(R, 1).astype(x.dtype)    # (R, 1)

    out2 = pl.pallas_call(
        _scale_bias_kernel,
        out_shape=jax.ShapeDtypeStruct((R, HW), x.dtype),
        grid=grid,
        in_specs=[x_spec, col_spec, col_spec],
        out_specs=o_spec,
        compiler_params=cparams,
    )(x2, scale_rows, bias_rows)
    return out2.reshape(N, C, H, W)


# ---------------- reference (plain JAX) for verification ----------------

def _reference(x, direction: ChangeState, input_channels: int):
    if direction == ChangeState.OFF:
        return x
    if direction == ChangeState.DENORMALIZE:
        return jax.nn.sigmoid(x)
    repeat = input_channels // 3
    mean = jnp.tile(IMAGENET_MEAN, repeat).reshape(1, -1, 1, 1)
    var = jnp.tile(IMAGENET_VAR, repeat).reshape(1, -1, 1, 1)
    return (x - mean) / jnp.sqrt(var + SIGMA_MIN)


if __name__ == "__main__":
    key = jax.random.PRNGKey(0)
    N, C, H, W = 2, 6, 16, 16  # C must be a multiple of 3 (repeat factor = 2)
    x = jax.random.uniform(key, (N, C, H, W), dtype=jnp.float32) * 255.0

    # NORMALIZE path (the compute-carrying direction)
    y_norm = change_image_stats_to_imagenet(x, ChangeState.NORMALIZE, input_channels=C)
    y_norm = jax.block_until_ready(y_norm)
    y_norm_ref = _reference(x, ChangeState.NORMALIZE, C)
    assert jnp.allclose(y_norm, y_norm_ref, atol=1e-5, rtol=1e-5)

    # DENORMALIZE path (sigmoid)
    y_den = change_image_stats_to_imagenet(x / 255.0 - 0.5, ChangeState.DENORMALIZE, input_channels=C)
    y_den = jax.block_until_ready(y_den)
    y_den_ref = _reference(x / 255.0 - 0.5, ChangeState.DENORMALIZE, C)
    assert jnp.allclose(y_den, y_den_ref, atol=1e-6, rtol=1e-6)

    # OFF path (identity, no kernel needed)
    y_off = change_image_stats_to_imagenet(x, ChangeState.OFF, input_channels=C)
    assert jnp.array_equal(y_off, x)

    print("KERNEL_OK")
</pallas_src>

<mosaic_0001>
module attributes {stable_mosaic.version = 11 : i64} {
  func.func @_scale_bias_kernel(%arg0: i32, %arg1: i32, %arg2: memref<16x256xf32, #tpu.memory_space<vmem>>, %arg3: memref<16x1xf32, #tpu.memory_space<vmem>>, %arg4: memref<16x1xf32, #tpu.memory_space<vmem>>, %arg5: memref<16x256xf32, #tpu.memory_space<vmem>>) attributes {dimension_semantics = [#tpu.dimension_semantics<parallel>, #tpu.dimension_semantics<parallel>], iteration_bounds = array<i64: 1, 1>, scalar_prefetch = 0 : i64, scratch_operands = 0 : i64, tpu.core_type = #tpu.core_type<tc>, window_params = [{transform_indices = @transform_0, window_bounds = array<i64: 16, 256>}, {transform_indices = @transform_1, window_bounds = array<i64: 16, 1>}, {transform_indices = @transform_2, window_bounds = array<i64: 16, 1>}, {transform_indices = @transform_3, window_bounds = array<i64: 16, 256>}]} {
    %c0 = arith.constant 0 : index
    %c0_0 = arith.constant 0 : index
    %0 = vector.load %arg2[%c0, %c0_0] : memref<16x256xf32, #tpu.memory_space<vmem>>, vector<16x256xf32>
    %c0_1 = arith.constant 0 : index
    %c0_2 = arith.constant 0 : index
    %1 = vector.load %arg3[%c0_1, %c0_2] : memref<16x1xf32, #tpu.memory_space<vmem>>, vector<16x1xf32>
    %2 = vector.broadcast %1 : vector<16x1xf32> to vector<16x256xf32>
    %3 = arith.mulf %0, %2 : vector<16x256xf32>
    %c0_3 = arith.constant 0 : index
    %c0_4 = arith.constant 0 : index
    %4 = vector.load %arg4[%c0_3, %c0_4] : memref<16x1xf32, #tpu.memory_space<vmem>>, vector<16x1xf32>
    %5 = vector.broadcast %4 : vector<16x1xf32> to vector<16x256xf32>
    %6 = arith.addf %3, %5 : vector<16x256xf32>
    %c0_5 = arith.constant 0 : index
    %c0_6 = arith.constant 0 : index
    %7 = vector.load %arg5[%c0_5, %c0_6] : memref<16x256xf32, #tpu.memory_space<vmem>>, vector<16x256xf32>
    tpu.vector_store %arg5[%c0_5, %c0_6], %6 {strides = array<i32>} : memref<16x256xf32, #tpu.memory_space<vmem>>, vector<16x256xf32>,
    return
  }
  func.func @transform_0(%arg0: i32, %arg1: i32) -> (i32, i32) {
    %c0_i32 = arith.constant 0 : i32
    return %arg0, %arg1 : i32, i32
  }
  func.func @transform_1(%arg0: i32, %arg1: i32) -> (i32, i32) {
    %c0_i32 = arith.constant 0 : i32
    %c0_i32_0 = arith.constant 0 : i32
    return %arg0, %c0_i32 : i32, i32
  }
  func.func @transform_2(%arg0: i32, %arg1: i32) -> (i32, i32) {
    %c0_i32 = arith.constant 0 : i32
    %c0_i32_0 = arith.constant 0 : i32
    return %arg0, %c0_i32 : i32, i32
  }
  func.func @transform_3(%arg0: i32, %arg1: i32) -> (i32, i32) {
    %c0_i32 = arith.constant 0 : i32
    return %arg0, %arg1 : i32, i32
  }
}

</mosaic_0001>

<bundles_post_ra>
// kernel: tpu_custom_call.1
= control target key start
LH: loop header
LB: loop body
LE: loop exit
PB: predicated region body
PF: predicated region fallthrough
CT: control target
= control target key end

     0   :  { %v101_v2 = vmov 0   ;;  %s161_s0 = inlined_call_operand.vmem [shape: f32[12,256], index: 0, kind: input, shape index: {}]   ;;  %s162_s1 = inlined_call_operand.vmem [shape: f32[12,1], index: 1, kind: input, shape index: {}]   ;;  %s163_s2 = inlined_call_operand.vmem [shape: f32[12,1], index: 2, kind: input, shape index: {}]   ;;  %s164_s3 = inlined_call_operand.hbm [shape: f32[12,256], index: 3, kind: output, shape index: {}]  }
   0x1   :  { %v35_v0 = vld [vmem:[%s163_s2] sm:$0xff]  ;;  %76 = vset.pattern.permute.xlu1 %v101_v2  ;;  %75 = vset.pattern.permute.xlu0 %v101_v2 }
   0x2   :  { %v19_v1 = vld [vmem:[%s162_s1] sm:$0xff]  ;;  %39 = vperm.xlu1 %76, %v35_v0  }
   0x3   :  { %23 = vperm.xlu0 %75, %v19_v1  }
   0x4   :  { %8 = vsyncpa [#allocation3], 0  ;;  %v36_v3 = vld [vmem:[%s163_s2 + $0x8] sm:$0xff]  ;;  %v15_v5 = vld [vmem:[%s161_s0] sm:$0xff]  ;;  %s102_s26 = smov [#allocation2]  }
   0x5   :  { %v20_v4 = vld [vmem:[%s162_s1 + $0x8] sm:$0xff]  ;;  %v17_v11 = vld [vmem:[%s161_s0 + $0x10] sm:$0xff]  ;;  %v18_v12 = vld [vmem:[%s161_s0 + $0x18] sm:$0xff]  ;;  %s60_s27 = sshll.u32 %s102_s26, 4  ;;  %s61_s27 = int_to_ptr.vmem [resolvable:$true] %s60_s27 }
   0x6   :  { %44 = vperm.xlu1 %76, %v36_v3   ;;  %v16_v6 = vld [vmem:[%s161_s0 + $0x8] sm:$0xff]  ;;  %s77_s28 = scalar_lea.vmem %s61_s27, 512  ;;  %p82_p1 = scmp.lt.s32.totalorder %s61_s27, %s61_s27 }
   0x7   :  { %28 = vperm.xlu0 %75, %v20_v4   ;;  %p78_p0 = scmp.ne.s32.totalorder %s61_s27, %s77_s28  ;;  %p83_p2 = scmp.lt.s32.totalorder %s77_s28, %s77_s28 }
   0x9   :  { %p84_p3 = por %p83_p2, %p82_p1 }
   0xb   :  { %p85_p4 = pnand %p84_p3, %p78_p0 }
  0x81   :  { %v40_v7 = vpop.permute.xlu1 %39 }
  0x82   :  { %v24_v8 = vpop.permute.xlu0 %23 }
  0x83   :  { %v31_v9 = vmul.f32 %v24_v8, %v15_v5  ;;  %v32_v10 = vmul.f32 %v24_v8, %v16_v6 }
  0x85   :  { %v47_v13 = vadd.f32 %v40_v7, %v31_v9  ;;  %v48_v14 = vadd.f32 %v40_v7, %v32_v10  ;;  %v45_v18 = vpop.permute.xlu1 %44 }
  0x86   :  { %v29_v15 = vpop.permute.xlu0 %28 }
  0x87   :  { %51 = vst [vmem:[#allocation2] sm:$0xff] %v47_v13  ;;  %52 = vst [vmem:[#allocation2 + $0x8] sm:$0xff] %v48_v14  ;;  %v33_v16 = vmul.f32 %v29_v15, %v17_v11  ;;  %v34_v17 = vmul.f32 %v29_v15, %v18_v12 }
  0x89   :  { %v49_v19 = vadd.f32 %v45_v18, %v33_v16  ;;  %v50_v20 = vadd.f32 %v45_v18, %v34_v17 }
  0x8b   :  { %53 = vst [vmem:[#allocation2 + $0x10] sm:$0xff] %v49_v19  ;;  %54 = vst [vmem:[#allocation2 + $0x18] sm:$0xff] %v50_v20 }
  0x8c   :  { %88 = shalt.err (!%p85_p4)
}
  0x8d   :  { %s89_s30 = scalar_lea.hbm %s164_s3, 512 }
  0x8e   :  { %p90_p5 = scmp.ne.s32.totalorder %s164_s3, %s89_s30  ;;  %p93_p6 = scmp.lt.u32.totalorder %s89_s30, %s164_s3 }
  0x90   :  { %p95_p7 = pnand %p93_p6, %p90_p5 }
  0x92   :  { %98 = shalt.err (!%p95_p7)
}
  0x93   :  { %s103_s8 = smov 256   ;;  %s104_s9 = smov 16  }
  0x94   :  { %66 = dma.vmem_to_hbm [thread:$0]  %s61_s27, 512, %s164_s3, [#allocation3], %s103_s8, %s103_s8, %s104_s9  }
  0x95   :  { %99 = dma.done.wait [#allocation3], 512  }
  0x96   :  { %100 = vsyncadd [#allocation3], 4294966784 }
  0x97   :  { %70 = vsyncpa [#allocation3], 1 }

</bundles_post_ra>
